<compile_context>
chip_gen: v6e
topology: v6e:2x2x1
jax: 0.10.0
libtpu: 0.0.40
codegen_flags: <defaults>
</compile_context>

<pallas_src>
import jax
import jax.numpy as jnp
from jax.experimental import pallas as pl
from jax.experimental.pallas import tpu as pltpu

_LANE = 128
_SUBLANE = 8
_MAX_BLOCK_ELEMS = 512 * 1024  # ~2 MiB of f32 per input block (per buffer)


def _dice_kernel(p_ref, m_ref, dice_ref, pm_acc, pp_acc, mm_acc):
    li = pl.program_id(1)
    n_l = pl.num_programs(1)  # static Python int for a static grid

    @pl.when(li == 0)
    def _():
        pm_acc[...] = jnp.zeros_like(pm_acc)
        pp_acc[...] = jnp.zeros_like(pp_acc)
        mm_acc[...] = jnp.zeros_like(mm_acc)

    p = p_ref[...].astype(jnp.float32)  # (TB, TL)
    m = m_ref[...].astype(jnp.float32)

    # Per-batch-row partial reductions; accumulate across spatial tiles.
    pm_acc[...] += jnp.sum(p * m, axis=-1, keepdims=True)
    pp_acc[...] += jnp.sum(p * p, axis=-1, keepdims=True)
    mm_acc[...] += jnp.sum(m * m, axis=-1, keepdims=True)

    @pl.when(li == n_l - 1)
    def _():
        eps = jnp.float32(1e-07)
        inter = pm_acc[...]                      # (TB, 1)
        den = pp_acc[...] + mm_acc[...]          # (TB, 1)
        dice = 2.0 * ((inter + eps) / (den + eps))
        # Lane-dense output block: broadcast the per-row dice over 128 lanes.
        dice_ref[...] = jnp.broadcast_to(dice, dice_ref.shape)


def _round_up(x, m):
    return (x + m - 1) // m * m


def dice_loss(output, mask):
    """output, mask: (B, 1, H, W) float arrays. Returns scalar f32 loss."""
    probs = jnp.squeeze(output, 1)  # (B, H, W)
    msk = jnp.squeeze(mask, 1)      # (B, H, W)
    B, H, W = probs.shape
    L = H * W

    # Lane-dense flattened layout.
    probs = probs.reshape(B, L)
    msk = msk.reshape(B, L)

    # Tile selection: whole (padded) image per step if it fits the block
    # budget; otherwise tile the spatial axis (keeps v7x's 64 MiB VMEM safe).
    l_full = _round_up(L, _LANE)
    if l_full * _SUBLANE <= _MAX_BLOCK_ELEMS:
        tl = l_full
        tb_cap = max(_SUBLANE, (_MAX_BLOCK_ELEMS // tl) // _SUBLANE * _SUBLANE)
        tb = min(_round_up(B, _SUBLANE), tb_cap)
    else:
        tl = (_MAX_BLOCK_ELEMS // _SUBLANE) // _LANE * _LANE
        tb = _SUBLANE

    l_pad = _round_up(L, tl)
    b_pad = _round_up(B, tb)

    if (b_pad, l_pad) != (B, L):
        probs = jnp.pad(probs, ((0, b_pad - B), (0, l_pad - L)))
        msk = jnp.pad(msk, ((0, b_pad - B), (0, l_pad - L)))

    grid = (b_pad // tb, l_pad // tl)

    dice = pl.pallas_call(
        _dice_kernel,
        out_shape=jax.ShapeDtypeStruct((b_pad, _LANE), jnp.float32),
        grid_spec=pltpu.PrefetchScalarGridSpec(
            num_scalar_prefetch=0,
            grid=grid,
            in_specs=[
                pl.BlockSpec((tb, tl), lambda bi, li: (bi, li)),
                pl.BlockSpec((tb, tl), lambda bi, li: (bi, li)),
            ],
            out_specs=pl.BlockSpec((tb, _LANE), lambda bi, li: (bi, 0)),
            scratch_shapes=[
                pltpu.VMEM((tb, 1), jnp.float32),  # sum(p*m) per row
                pltpu.VMEM((tb, 1), jnp.float32),  # sum(p*p) per row
                pltpu.VMEM((tb, 1), jnp.float32),  # sum(m*m) per row
            ],
        ),
        compiler_params=pltpu.CompilerParams(
            dimension_semantics=("parallel", "arbitrary"),
            vmem_limit_bytes=32 * 1024 * 1024,
        ),
    )(probs, msk)

    per_batch_dice = dice[:B, 0]  # drop padded batch rows
    return 1.0 - jnp.sum(per_batch_dice) / jnp.float32(B)


def _dice_loss_ref(output, mask):
    probs = jnp.squeeze(output, 1).astype(jnp.float32)
    msk = jnp.squeeze(mask, 1).astype(jnp.float32)
    inter = jnp.sum(probs * msk, axis=(1, 2))
    den1 = jnp.sum(probs * probs, axis=(1, 2))
    den2 = jnp.sum(msk * msk, axis=(1, 2))
    eps = 1e-07
    dice = 2.0 * ((inter + eps) / (den1 + den2 + eps))
    return 1.0 - jnp.sum(dice) / dice.shape[0]


if __name__ == "__main__":
    key = jax.random.PRNGKey(0)
    k1, k2 = jax.random.split(key)
    B, C, H, W = 2, 1, 16, 16
    output = jax.nn.sigmoid(jax.random.normal(k1, (B, C, H, W), jnp.float32))
    mask = (jax.random.uniform(k2, (B, C, H, W)) > 0.5).astype(jnp.float32)

    loss = jax.block_until_ready(dice_loss(output, mask))
    ref = jax.block_until_ready(_dice_loss_ref(output, mask))
    assert jnp.allclose(loss, ref, atol=1e-5, rtol=1e-5), (loss, ref)
    print("KERNEL_OK")
</pallas_src>

<mosaic_0001>
module attributes {stable_mosaic.version = 11 : i64} {
  func.func @_dice_kernel(%arg0: i32, %arg1: i32, %arg2: memref<8x256xf32, #tpu.memory_space<vmem>>, %arg3: memref<8x256xf32, #tpu.memory_space<vmem>>, %arg4: memref<8x128xf32, #tpu.memory_space<vmem>>, %arg5: memref<8x1xf32, #tpu.memory_space<vmem>>, %arg6: memref<8x1xf32, #tpu.memory_space<vmem>>, %arg7: memref<8x1xf32, #tpu.memory_space<vmem>>) attributes {dimension_semantics = [#tpu.dimension_semantics<parallel>, #tpu.dimension_semantics<arbitrary>], iteration_bounds = array<i64: 1, 1>, scalar_prefetch = 0 : i64, scratch_operands = 3 : i64, tpu.core_type = #tpu.core_type<tc>, window_params = [{transform_indices = @transform_0, window_bounds = array<i64: 8, 256>}, {transform_indices = @transform_1, window_bounds = array<i64: 8, 256>}, {transform_indices = @transform_2, window_bounds = array<i64: 8, 128>}]} {
    %c0_i32 = arith.constant 0 : i32
    %0 = arith.cmpi eq, %arg1, %c0_i32 : i32
    %1 = arith.extui %0 : i1 to i32
    %c0_i32_0 = arith.constant 0 : i32
    %2 = arith.cmpi ne, %1, %c0_i32_0 : i32
    scf.if %2 {
      %cst_20 = arith.constant 0.000000e+00 : f32
      %26 = vector.broadcast %cst_20 : f32 to vector<8x1xf32>
      %c0_21 = arith.constant 0 : index
      %c0_22 = arith.constant 0 : index
      %27 = vector.load %arg5[%c0_21, %c0_22] : memref<8x1xf32, #tpu.memory_space<vmem>>, vector<8x1xf32>
      tpu.vector_store %arg5[%c0_21, %c0_22], %26 {strides = array<i32>} : memref<8x1xf32, #tpu.memory_space<vmem>>, vector<8x1xf32>,
      %cst_23 = arith.constant 0.000000e+00 : f32
      %28 = vector.broadcast %cst_23 : f32 to vector<8x1xf32>
      %c0_24 = arith.constant 0 : index
      %c0_25 = arith.constant 0 : index
      %29 = vector.load %arg6[%c0_24, %c0_25] : memref<8x1xf32, #tpu.memory_space<vmem>>, vector<8x1xf32>
      tpu.vector_store %arg6[%c0_24, %c0_25], %28 {strides = array<i32>} : memref<8x1xf32, #tpu.memory_space<vmem>>, vector<8x1xf32>,
      %cst_26 = arith.constant 0.000000e+00 : f32
      %30 = vector.broadcast %cst_26 : f32 to vector<8x1xf32>
      %c0_27 = arith.constant 0 : index
      %c0_28 = arith.constant 0 : index
      %31 = vector.load %arg7[%c0_27, %c0_28] : memref<8x1xf32, #tpu.memory_space<vmem>>, vector<8x1xf32>
      tpu.vector_store %arg7[%c0_27, %c0_28], %30 {strides = array<i32>} : memref<8x1xf32, #tpu.memory_space<vmem>>, vector<8x1xf32>,
    } else {
    }
    %c0 = arith.constant 0 : index
    %c0_1 = arith.constant 0 : index
    %3 = vector.load %arg2[%c0, %c0_1] : memref<8x256xf32, #tpu.memory_space<vmem>>, vector<8x256xf32>
    %c0_2 = arith.constant 0 : index
    %c0_3 = arith.constant 0 : index
    %4 = vector.load %arg3[%c0_2, %c0_3] : memref<8x256xf32, #tpu.memory_space<vmem>>, vector<8x256xf32>
    %c0_4 = arith.constant 0 : index
    %c0_5 = arith.constant 0 : index
    %5 = vector.load %arg5[%c0_4, %c0_5] : memref<8x1xf32, #tpu.memory_space<vmem>>, vector<8x1xf32>
    %6 = arith.mulf %3, %4 : vector<8x256xf32>
    %cst = arith.constant dense<0.000000e+00> : vector<8xf32>
    %7 = vector.multi_reduction <add>, %6, %cst [1] : vector<8x256xf32> to vector<8xf32>
    %8 = vector.shape_cast %7 : vector<8xf32> to vector<8x1xf32>
    %9 = arith.addf %5, %8 : vector<8x1xf32>
    %c0_6 = arith.constant 0 : index
    %c0_7 = arith.constant 0 : index
    %10 = vector.load %arg5[%c0_6, %c0_7] : memref<8x1xf32, #tpu.memory_space<vmem>>, vector<8x1xf32>
    tpu.vector_store %arg5[%c0_6, %c0_7], %9 {strides = array<i32>} : memref<8x1xf32, #tpu.memory_space<vmem>>, vector<8x1xf32>,
    %c0_8 = arith.constant 0 : index
    %c0_9 = arith.constant 0 : index
    %11 = vector.load %arg6[%c0_8, %c0_9] : memref<8x1xf32, #tpu.memory_space<vmem>>, vector<8x1xf32>
    %12 = arith.mulf %3, %3 : vector<8x256xf32>
    %cst_10 = arith.constant dense<0.000000e+00> : vector<8xf32>
    %13 = vector.multi_reduction <add>, %12, %cst_10 [1] : vector<8x256xf32> to vector<8xf32>
    %14 = vector.shape_cast %13 : vector<8xf32> to vector<8x1xf32>
    %15 = arith.addf %11, %14 : vector<8x1xf32>
    %c0_11 = arith.constant 0 : index
    %c0_12 = arith.constant 0 : index
    %16 = vector.load %arg6[%c0_11, %c0_12] : memref<8x1xf32, #tpu.memory_space<vmem>>, vector<8x1xf32>
    tpu.vector_store %arg6[%c0_11, %c0_12], %15 {strides = array<i32>} : memref<8x1xf32, #tpu.memory_space<vmem>>, vector<8x1xf32>,
    %c0_13 = arith.constant 0 : index
    %c0_14 = arith.constant 0 : index
    %17 = vector.load %arg7[%c0_13, %c0_14] : memref<8x1xf32, #tpu.memory_space<vmem>>, vector<8x1xf32>
    %18 = arith.mulf %4, %4 : vector<8x256xf32>
    %cst_15 = arith.constant dense<0.000000e+00> : vector<8xf32>
    %19 = vector.multi_reduction <add>, %18, %cst_15 [1] : vector<8x256xf32> to vector<8xf32>
    %20 = vector.shape_cast %19 : vector<8xf32> to vector<8x1xf32>
    %21 = arith.addf %17, %20 : vector<8x1xf32>
    %c0_16 = arith.constant 0 : index
    %c0_17 = arith.constant 0 : index
    %22 = vector.load %arg7[%c0_16, %c0_17] : memref<8x1xf32, #tpu.memory_space<vmem>>, vector<8x1xf32>
    tpu.vector_store %arg7[%c0_16, %c0_17], %21 {strides = array<i32>} : memref<8x1xf32, #tpu.memory_space<vmem>>, vector<8x1xf32>,
    %c0_i32_18 = arith.constant 0 : i32
    %23 = arith.cmpi eq, %arg1, %c0_i32_18 : i32
    %24 = arith.extui %23 : i1 to i32
    %c0_i32_19 = arith.constant 0 : i32
    %25 = arith.cmpi ne, %24, %c0_i32_19 : i32
    scf.if %25 {
      %c0_20 = arith.constant 0 : index
      %c0_21 = arith.constant 0 : index
      %26 = vector.load %arg5[%c0_20, %c0_21] : memref<8x1xf32, #tpu.memory_space<vmem>>, vector<8x1xf32>
      %c0_22 = arith.constant 0 : index
      %c0_23 = arith.constant 0 : index
      %27 = vector.load %arg6[%c0_22, %c0_23] : memref<8x1xf32, #tpu.memory_space<vmem>>, vector<8x1xf32>
      %c0_24 = arith.constant 0 : index
      %c0_25 = arith.constant 0 : index
      %28 = vector.load %arg7[%c0_24, %c0_25] : memref<8x1xf32, #tpu.memory_space<vmem>>, vector<8x1xf32>
      %29 = arith.addf %27, %28 : vector<8x1xf32>
      %cst_26 = arith.constant 1.000000e-07 : f32
      %30 = vector.broadcast %cst_26 : f32 to vector<8x1xf32>
      %31 = arith.addf %26, %30 : vector<8x1xf32>
      %cst_27 = arith.constant 1.000000e-07 : f32
      %32 = vector.broadcast %cst_27 : f32 to vector<8x1xf32>
      %33 = arith.addf %29, %32 : vector<8x1xf32>
      %34 = arith.divf %31, %33 : vector<8x1xf32>
      %cst_28 = arith.constant 2.000000e+00 : f32
      %35 = vector.broadcast %cst_28 : f32 to vector<8x1xf32>
      %36 = arith.mulf %35, %34 : vector<8x1xf32>
      %37 = vector.shape_cast %36 : vector<8x1xf32> to vector<8x1xf32>
      %38 = vector.broadcast %37 : vector<8x1xf32> to vector<8x128xf32>
      %c0_29 = arith.constant 0 : index
      %c0_30 = arith.constant 0 : index
      %39 = vector.load %arg4[%c0_29, %c0_30] : memref<8x128xf32, #tpu.memory_space<vmem>>, vector<8x128xf32>
      tpu.vector_store %arg4[%c0_29, %c0_30], %38 {strides = array<i32>} : memref<8x128xf32, #tpu.memory_space<vmem>>, vector<8x128xf32>,
    } else {
    }
    return
  }
  func.func @transform_0(%arg0: i32, %arg1: i32) -> (i32, i32) {
    %c0_i32 = arith.constant 0 : i32
    return %arg0, %arg1 : i32, i32
  }
  func.func @transform_1(%arg0: i32, %arg1: i32) -> (i32, i32) {
    %c0_i32 = arith.constant 0 : i32
    return %arg0, %arg1 : i32, i32
  }
  func.func @transform_2(%arg0: i32, %arg1: i32) -> (i32, i32) {
    %c0_i32 = arith.constant 0 : i32
    %c0_i32_0 = arith.constant 0 : i32
    return %arg0, %c0_i32 : i32, i32
  }
}

</mosaic_0001>

<bundles_post_ra>
// kernel: tpu_custom_call.1
= control target key start
LH: loop header
LB: loop body
LE: loop exit
PB: predicated region body
PF: predicated region fallthrough
CT: control target
= control target key end

     0   :  { %7 = vsyncpa [#allocation6], 0  ;;  %s217_s0 = inlined_call_operand.hbm [shape: f32[8,256], index: 0, kind: input, shape index: {}]   ;;  %s218_s1 = inlined_call_operand.hbm [shape: f32[8,256], index: 1, kind: input, shape index: {}]   ;;  %s219_s2 = inlined_call_operand.hbm [shape: f32[8,128], index: 2, kind: output, shape index: {}]  }
   0x1   :  { %8 = vsyncpa [#allocation9], 0 }
   0x2   :  { %9 = vsyncpa [#allocation7], 0  ;;  %s182_s9 = smov [#allocation5]   ;;  %s183_s11 = smov [#allocation8]  }
   0x3   :  { %s16_s10 = sshll.u32 %s182_s9, 4  ;;  %s26_s12 = sshll.u32 %s183_s11, 4  ;;  %s17_s10 = int_to_ptr.vmem [resolvable:$true] %s16_s10  ;;  %s27_s12 = int_to_ptr.vmem [resolvable:$true] %s26_s12 }
   0x4   :  { %s124_s13 = scalar_lea.vmem %s17_s10, 256  ;;  %p129_p1 = scmp.lt.s32.totalorder %s17_s10, %s17_s10 }
   0x5   :  { %p125_p0 = scmp.ne.s32.totalorder %s17_s10, %s124_s13  ;;  %p130_p2 = scmp.lt.s32.totalorder %s124_s13, %s124_s13 }
   0x7   :  { %p131_p3 = por %p130_p2, %p129_p1 }
   0x9   :  { %p132_p4 = pnand %p131_p3, %p125_p0 }
   0xb   :  { %135 = shalt.err (!%p132_p4)
}
   0xc   :  { %19 = dma.hbm_to_vmem [thread:$0]  %s217_s0, 256, %s17_s10, [#allocation6]  }
   0xd   :  { %s144_s16 = scalar_lea.vmem %s27_s12, 256  ;;  %p149_p6 = scmp.lt.s32.totalorder %s27_s12, %s27_s12 }
   0xe   :  { %p145_p5 = scmp.ne.s32.totalorder %s27_s12, %s144_s16  ;;  %p150_p7 = scmp.lt.s32.totalorder %s144_s16, %s144_s16 }
  0x10   :  { %p151_p8 = por %p150_p7, %p149_p6 }
  0x12   :  { %p152_p9 = pnand %p151_p8, %p145_p5 }
  0x14   :  { %155 = shalt.err (!%p152_p9)
}
  0x15   :  { %29 = dma.hbm_to_vmem [thread:$0]  %s218_s1, 256, %s27_s12, [#allocation9]  }
  0x16   :  { %176 = dma.done.wait [#allocation6], 256  }
  0x17   :  { %177 = vsyncadd [#allocation6], 4294967040 }
  0x18   :  { %178 = dma.done.wait [#allocation9], 256  }
  0x19   :  { %179 = vsyncadd [#allocation9], 4294967040  ;;  %vm40_vm0 = vcmask 7168   ;;  %v184_v0 = vmov 0.0   ;;  %v44_v1 = vld [vmem:[#allocation5] sm:$0xff]  ;;  %v45_v2 = vld [vmem:[#allocation5 + $0x8] sm:$0xff] }
  0x1a   :  { %42 = vst.msk [vmem:[#allocation3] sm:$0xff] %vm40_vm0, %v184_v0  ;;  %41 = vst.msk [vmem:[#allocation2] sm:$0xff] %vm40_vm0, %v184_v0  ;;  %v46_v3 = vld [vmem:[#allocation8] sm:$0xff]  ;;  %v58_v4 = vmul.f32 %v44_v1, %v44_v1  ;;  %v59_v5 = vmul.f32 %v45_v2, %v45_v2  ;;  %v47_v6 = vld [vmem:[#allocation8 + $0x8] sm:$0xff]  ;;  %v185_v14 = vmov 0   ;;  %s186_s0 = smov [#allocation10]  }
  0x1b   :  { %43 = vst.msk [vmem:[#allocation4] sm:$0xff] %vm40_vm0, %v184_v0  ;;  %v66_v7 = vmul.f32 %v46_v3, %v46_v3  ;;  %v49_v8 = vmul.f32 %v46_v3, %v44_v1  ;;  %v67_v9 = vmul.f32 %v47_v6, %v47_v6  ;;  %v50_v10 = vmul.f32 %v47_v6, %v45_v2  ;;  %s97_s1 = sshll.u32 %s186_s0, 4  ;;  %s98_s1 = int_to_ptr.vmem [resolvable:$true] %s97_s1 }
  0x1c   :  { %v60_v11 = vadd.f32 %v59_v5, %v58_v4  ;;  %112 = vset.pattern.permute.xlu1 %v185_v14  ;;  %113 = vset.pattern.permute.xlu0 %v185_v14  ;;  %s156_s19 = scalar_lea.vmem %s98_s1, 128  ;;  %p161_p11 = scmp.lt.s32.totalorder %s98_s1, %s98_s1 }
  0x1d   :  { %v51_v12 = vadd.f32 %v50_v10, %v49_v8  ;;  %v68_v13 = vadd.f32 %v67_v9, %v66_v7  ;;  %p157_p10 = scmp.ne.s32.totalorder %s98_s1, %s156_s19  ;;  %p162_p12 = scmp.lt.s32.totalorder %s156_s19, %s156_s19 }
  0x1e   :  { %61 = vadd.xlane.f32.xlu0 %v60_v11 }
  0x1f   :  { %52 = vadd.xlane.f32.xlu1 %v51_v12  ;;  %p163_p13 = por %p162_p12, %p161_p11 }
  0x21   :  { %v57_v15 = vld [vmem:[#allocation3] sm:$0xff]  ;;  %v48_v16 = vld [vmem:[#allocation2] sm:$0xff]  ;;  %p164_p0 = pnand %p163_p13, %p157_p10 }
  0x22   :  { %69 = vadd.xlane.f32.xlu0 %v68_v13  ;;  %v65_v20 = vld [vmem:[#allocation4] sm:$0xff] }
  0xa7   :  { %v62_v17 = vpop.xlane.xlu0 %61 }
  0xa8   :  { %v63_v18 = vadd.f32 %v62_v17, %v57_v15  ;;  %v53_v19 = vpop.xlane.xlu1 %52 }
  0xa9   :  { %v54_v21 = vadd.f32 %v53_v19, %v48_v16 }
  0xaa   :  { %64 = vst.msk [vmem:[#allocation3] sm:$0xff] %vm40_vm0, %v63_v18 }
  0xab   :  { %v70_v22 = vpop.xlane.xlu0 %69  ;;  %56 = vst.msk [vmem:[#allocation2] sm:$0xff] %vm40_vm0, %v54_v21 }
  0xac   :  { %v71_v23 = vadd.f32 %v70_v22, %v65_v20 }
  0xae   :  { %72 = vst.msk [vmem:[#allocation4] sm:$0xff] %vm40_vm0, %v71_v23 }
  0xb1   :  { %v77_v24 = vld [vmem:[#allocation3] sm:$0xff] }
  0xb2   :  { %v76_v28 = vld [vmem:[#allocation2] sm:$0xff] }
  0xb3   :  { %v80_v29 = vadd.f32 1e-07, %v76_v28 }
  0xb5   :  { %v78_v25 = vld [vmem:[#allocation4] sm:$0xff] }
  0xb6   :  { %v79_v26 = vadd.f32 %v78_v25, %v77_v24 }
  0xb8   :  { %v81_v27 = vadd.f32 1e-07, %v79_v26 }
  0xba   :  { %114 = vrcp.f32 %v81_v27 }
  0xc7   :  { %v115_v30 = vpop.eup %114 }
  0xc8   :  { %v83_v31 = vmul.f32 %v115_v30, %v80_v29 }
  0xca   :  { %v84_v32 = vmul.f32 2.0, %v83_v31 }
  0xcc   :  { %87 = vperm.xlu1 %112, %v84_v32  }
 0x147   :  { %v88_v33 = vpop.permute.xlu1 %87 }
 0x148   :  { %90 = vst [vmem:[#allocation10] sm:$0xff] %v88_v33 }
 0x149   :  { %167 = shalt.err (!%p164_p0)
}
 0x14a   :  { %100 = dma.vmem_to_hbm [thread:$0]  %s98_s1, 128, %s219_s2, [#allocation7]  }
 0x14b   :  { %180 = dma.done.wait [#allocation7], 128  }
 0x14c   :  { %181 = vsyncadd [#allocation7], 4294967168 }
 0x14d   :  { %104 = vsyncpa [#allocation6], 1 }
 0x14e   :  { %105 = vsyncpa [#allocation9], 1 }
 0x14f   :  { %106 = vsyncpa [#allocation7], 1 }

</bundles_post_ra>
